<compile_context>
chip_gen: v7x
topology: tpu7x:2x2x1
jax: 0.10.0
libtpu: 0.0.40
codegen_flags: <defaults>
</compile_context>

<pallas_src>
import jax
import jax.numpy as jnp
from jax.experimental import pallas as pl
from jax.experimental.pallas import tpu as pltpu


def _vmem_capacity_bytes() -> int:
    """Per-TensorCore VMEM capacity; conservative fallback if unqueryable."""
    try:
        cap = int(pltpu.get_tpu_info().vmem_capacity_bytes)
        if cap > 0:
            return cap
    except Exception:
        pass
    return 64 << 20  # v7x per-TC size: safe lower bound for all generations


def _make_tv_kernel(tb: int, num_planes: int, needs_mask: bool):
    """Kernel over a (tb, H, W) block of planes -> one (1, 8, 128) partial slab."""

    def kernel(x_ref, out_ref):
        # Widen in-kernel so HBM traffic stays at the input's native width.
        # TODO(synk): for bf16/fp8 inputs on v6e/v7x the neighbour subtraction
        # could stay in the narrow dtype (bf16 VALU) and only the square +
        # accumulate run in f32; kept f32 throughout for accuracy and v5e.
        x = x_ref[...].astype(jnp.float32)            # (tb, H, W)
        if needs_mask:
            # Tail block: planes at/after `num_planes` hold stale VMEM data;
            # zero them so they contribute nothing to either sum.
            start = pl.program_id(0) * tb
            plane = jax.lax.broadcasted_iota(jnp.int32, x.shape, 0) + start
            x = jnp.where(plane < num_planes, x, 0.0)

        dh = x[:, 1:, :] - x[:, :-1, :]               # vertical diffs / plane
        dw = x[:, :, 1:] - x[:, :, :-1]               # horizontal diffs / plane
        dh_sum = jnp.sum(dh * dh)
        dw_sum = jnp.sum(dw * dw)

        # Single lane-dense (8, 128) output slab per step: dh partial sum in
        # sublanes 0-3, dw partial sum in sublanes 4-7 -> one unmasked,
        # full-vreg store and a single output DMA per grid step.
        row = jax.lax.broadcasted_iota(jnp.int32, out_ref.shape, 1)
        out_ref[...] = jnp.where(row < 4, dh_sum, dw_sum)

    return kernel


def _planes_per_block(num_planes, plane_elems, itemsize, vmem_cap, override):
    if override is not None:
        return max(1, min(num_planes, int(override)))
    # Per-step VMEM footprint ~= 2 * input block (double-buffered pipeline)
    #                          + ~5 * f32-widened block (x, dh, dw, squares).
    bytes_per_elem = 2 * itemsize + 5 * 4
    budget = int(vmem_cap * 0.65)
    # ~6 MiB f32 blocks on v7x (64 MiB/TC), ~12 MiB on v5e/v6e (128 MiB);
    # capped at 16 MiB -- beyond that per-step overhead is already <5%.
    f32_target = min(16 << 20, (budget // bytes_per_elem) * 4)
    target = max(1, f32_target // (plane_elems * 4))
    # Prefer >= 4 grid steps (DMA/compute overlap + megacore sharding on v7x)
    # as long as each step still moves >= ~1 MiB of f32 work.
    if num_planes * plane_elems * 4 >= 4 * (1 << 20):
        target = min(target, -(-num_planes // 4))
    return min(num_planes, max(1, target))


def total_variation_loss(x, weight: float = 1.0, *, block_planes=None):
    """Pallas implementation of TotalVariationLoss.forward (NCHW input)."""
    B, C, H, W = x.shape
    G = B * C
    norm = 2.0 * weight / B

    if H < 2 or W < 2 or G == 0:
        # Degenerate spatial sizes: match the module directly (including its
        # division-by-zero behaviour) without zero-sized in-kernel slices.
        xf = x.astype(jnp.float32)
        dh = jnp.sum((xf[:, :, 1:, :] - xf[:, :, :-1, :]) ** 2)
        dw = jnp.sum((xf[:, :, :, 1:] - xf[:, :, :, :-1]) ** 2)
        return norm * (dh / ((H - 1) * W) + dw / (H * (W - 1)))

    xr = x.reshape(G, H, W)                # free: merges leading dims only
    itemsize = jnp.dtype(x.dtype).itemsize
    plane_elems = H * W
    vmem_cap = _vmem_capacity_bytes()

    tb = _planes_per_block(G, plane_elems, itemsize, vmem_cap, block_planes)
    num_steps = -(-G // tb)
    needs_mask = (G % tb) != 0
    # TODO(synk): planes too large to fit in VMEM on their own (e.g. a
    # 4096x4096 f32 plane on v7x) would need H-tiling with a one-row halo;
    # not implemented here.

    in_block = tb * plane_elems * itemsize
    f32_block = tb * plane_elems * 4
    vmem_limit = int(
        max(16 << 20, min(vmem_cap, 2 * in_block + 5 * f32_block + (2 << 20)))
    )

    out_slab = pl.pallas_call(
        _make_tv_kernel(tb, G, needs_mask),
        out_shape=jax.ShapeDtypeStruct((num_steps, 8, 128), jnp.float32),
        grid_spec=pltpu.PrefetchScalarGridSpec(
            num_scalar_prefetch=0,
            grid=(num_steps,),
            in_specs=[
                # (tb, H, W): last two dims equal the full array dims, so the
                # (8, 128) tiling constraint is satisfied and each grid step
                # issues one large contiguous DMA of tb planes.
                pl.BlockSpec((tb, H, W), lambda i: (i, 0, 0)),
            ],
            out_specs=pl.BlockSpec((1, 8, 128), lambda i: (i, 0, 0)),
        ),
        compiler_params=pltpu.CompilerParams(
            # Independent per-step partial sums -> steps can be sharded across
            # TensorCores (v7x megacore; neutral on single-TC v5e/v6e).
            dimension_semantics=("parallel",),
            vmem_limit_bytes=vmem_limit,
        ),
    )(xr)

    dh_sum = jnp.sum(out_slab[:, 0, 0])
    dw_sum = jnp.sum(out_slab[:, 4, 0])
    return norm * (dh_sum / ((H - 1) * W) + dw_sum / (H * (W - 1)))


def _reference(x, weight: float = 1.0):
    xf = x.astype(jnp.float32)
    dh = jnp.sum((xf[:, :, 1:, :] - xf[:, :, :-1, :]) ** 2)
    dw = jnp.sum((xf[:, :, :, 1:] - xf[:, :, :, :-1]) ** 2)
    B, _, H, W = x.shape
    norm = 2.0 * weight / B
    return norm * (dh / ((H - 1) * W) + dw / (H * (W - 1)))


if __name__ == "__main__":
    k0, k1 = jax.random.split(jax.random.PRNGKey(0))

    x = jax.random.normal(k0, (2, 4, 16, 16), dtype=jnp.float32)
    out = jax.block_until_ready(total_variation_loss(x, weight=1.0))
    ref = _reference(x, weight=1.0)
    assert jnp.allclose(out, ref, rtol=1e-5, atol=1e-5), (out, ref)

    # Ragged plane count with a forced small block size: exercises the
    # masked-tail path (G=3 planes, 2 planes per step, 2 grid steps).
    x2 = jax.random.normal(k1, (1, 3, 16, 16), dtype=jnp.float32)
    out2 = jax.block_until_ready(
        total_variation_loss(x2, weight=0.5, block_planes=2)
    )
    ref2 = _reference(x2, weight=0.5)
    assert jnp.allclose(out2, ref2, rtol=1e-5, atol=1e-5), (out2, ref2)

    print("KERNEL_OK")
</pallas_src>

<mosaic_0001>
module attributes {stable_mosaic.version = 11 : i64} {
  func.func @kernel(%arg0: i32, %arg1: memref<8x16x16xf32, #tpu.memory_space<vmem>>, %arg2: memref<1x8x128xf32, #tpu.memory_space<vmem>>) attributes {dimension_semantics = [#tpu.dimension_semantics<parallel>], iteration_bounds = array<i64: 1>, scalar_prefetch = 0 : i64, scratch_operands = 0 : i64, tpu.core_type = #tpu.core_type<tc>, window_params = [{transform_indices = @transform_0, window_bounds = array<i64: 8, 16, 16>}, {transform_indices = @transform_1, window_bounds = array<i64: 1, 8, 128>}]} {
    %c0 = arith.constant 0 : index
    %c0_0 = arith.constant 0 : index
    %c0_1 = arith.constant 0 : index
    %0 = vector.load %arg1[%c0, %c0_0, %c0_1] : memref<8x16x16xf32, #tpu.memory_space<vmem>>, vector<8x16x16xf32>
    %1 = vector.extract_strided_slice %0 {offsets = [0, 1, 0], sizes = [8, 15, 16], strides = [1, 1, 1]} : vector<8x16x16xf32> to vector<8x15x16xf32>
    %2 = vector.extract_strided_slice %0 {offsets = [0, 0, 0], sizes = [8, 15, 16], strides = [1, 1, 1]} : vector<8x16x16xf32> to vector<8x15x16xf32>
    %3 = arith.subf %1, %2 : vector<8x15x16xf32>
    %4 = vector.extract_strided_slice %0 {offsets = [0, 0, 1], sizes = [8, 16, 15], strides = [1, 1, 1]} : vector<8x16x16xf32> to vector<8x16x15xf32>
    %5 = vector.extract_strided_slice %0 {offsets = [0, 0, 0], sizes = [8, 16, 15], strides = [1, 1, 1]} : vector<8x16x16xf32> to vector<8x16x15xf32>
    %6 = arith.subf %4, %5 : vector<8x16x15xf32>
    %7 = arith.mulf %3, %3 : vector<8x15x16xf32>
    %8 = vector.shape_cast %7 : vector<8x15x16xf32> to vector<1x8x15x16xf32>
    %cst = arith.constant dense<0.000000e+00> : vector<1xf32>
    %9 = vector.multi_reduction <add>, %8, %cst [1, 2, 3] : vector<1x8x15x16xf32> to vector<1xf32>
    %10 = vector.shape_cast %9 : vector<1xf32> to vector<1x1x1x1xf32>
    %11 = vector.extract %10[0, 0, 0, 0] : f32 from vector<1x1x1x1xf32>
    %12 = arith.mulf %6, %6 : vector<8x16x15xf32>
    %13 = vector.shape_cast %12 : vector<8x16x15xf32> to vector<1x8x16x15xf32>
    %cst_2 = arith.constant dense<0.000000e+00> : vector<1xf32>
    %14 = vector.multi_reduction <add>, %13, %cst_2 [1, 2, 3] : vector<1x8x16x15xf32> to vector<1xf32>
    %15 = vector.shape_cast %14 : vector<1xf32> to vector<1x1x1x1xf32>
    %16 = vector.extract %15[0, 0, 0, 0] : f32 from vector<1x1x1x1xf32>
    %17 = tpu.iota {dimensions = array<i32: 1>} : vector<1x8x128xi32>
    %c4_i32 = arith.constant 4 : i32
    %18 = vector.broadcast %c4_i32 : i32 to vector<1x8x128xi32>
    %19 = arith.cmpi slt, %17, %18 : vector<1x8x128xi32>
    %20 = vector.broadcast %11 : f32 to vector<1x8x128xf32>
    %21 = vector.broadcast %16 : f32 to vector<1x8x128xf32>
    %22 = arith.select %19, %20, %21 : vector<1x8x128xi1>, vector<1x8x128xf32>
    %c0_3 = arith.constant 0 : index
    %c0_4 = arith.constant 0 : index
    %c0_5 = arith.constant 0 : index
    %23 = vector.load %arg2[%c0_3, %c0_4, %c0_5] : memref<1x8x128xf32, #tpu.memory_space<vmem>>, vector<1x8x128xf32>
    tpu.vector_store %arg2[%c0_3, %c0_4, %c0_5], %22 {strides = array<i32>} : memref<1x8x128xf32, #tpu.memory_space<vmem>>, vector<1x8x128xf32>,
    return
  }
  func.func @transform_0(%arg0: i32) -> (i32, i32, i32) {
    %c0_i32 = arith.constant 0 : i32
    %c0_i32_0 = arith.constant 0 : i32
    %c0_i32_1 = arith.constant 0 : i32
    return %arg0, %c0_i32, %c0_i32_0 : i32, i32, i32
  }
  func.func @transform_1(%arg0: i32) -> (i32, i32, i32) {
    %c0_i32 = arith.constant 0 : i32
    %c0_i32_0 = arith.constant 0 : i32
    %c0_i32_1 = arith.constant 0 : i32
    return %arg0, %c0_i32, %c0_i32_0 : i32, i32, i32
  }
}

</mosaic_0001>

<bundles_post_ra>
// kernel: tpu_custom_call.1
= control target key start
LH: loop header
LB: loop body
LE: loop exit
PB: predicated region body
PF: predicated region fallthrough
CT: control target
= control target key end

     0   :  { %6 = vsyncpa [#allocation3], 0  ;;  %s692_s0 = inlined_call_operand.hbm [shape: f32[8,16,16], index: 0, kind: input, shape index: {}]   ;;  %s693_s1 = inlined_call_operand.hbm [shape: f32[1,8,128], index: 1, kind: output, shape index: {}]  }
   0x1   :  { %7 = vsyncpa [#allocation4], 0  ;;  %s492_s6 = smov [#allocation2]   ;;  %s444_s10 = scalar_lea.hbm %s692_s0, 2048 }
   0x2   :  { %s13_s7 = sshll.u32 %s492_s6, 4  ;;  %p445_p0 = scmp.ne.s32.totalorder %s692_s0, %s444_s10  ;;  %s14_s7 = int_to_ptr.vmem [resolvable:$true] %s13_s7 }
   0x3   :  { %p448_p1 = scmp.lt.u32.totalorder %s444_s10, %s692_s0 }
   0x5   :  { %p450_p2 = pnand %p448_p1, %p445_p0 }
   0x7   :  { %453 = shalt.err (!%p450_p2)
}
   0x8   :  { %s454_s15 = scalar_lea.vmem %s14_s7, 2048  ;;  %p459_p4 = scmp.lt.s32.totalorder %s14_s7, %s14_s7 }
   0x9   :  { %p455_p3 = scmp.ne.s32.totalorder %s14_s7, %s454_s15  ;;  %p460_p5 = scmp.lt.s32.totalorder %s454_s15, %s454_s15 }
   0xb   :  { %p461_p6 = por %p460_p5, %p459_p4 }
   0xd   :  { %p462_p7 = pnand %p461_p6, %p455_p3 }
   0xf   :  { %465 = shalt.err (!%p462_p7)
}
  0x10   :  { %s493_s16 = smov 128   ;;  %s494_s17 = smov 8  }
  0x11   :  { %19 = dma.hbm_to_vmem [thread:$0]  %s692_s0, 2048, %s14_s7, [#allocation3], %s493_s16, %s493_s16, %s494_s17  }
  0x12   :  { %488 = dma.done.wait [#allocation3], 2048  }
  0x13   :  { %489 = vsyncadd [#allocation3], 4294965248  ;;  %v520_v0 = vld [vmem:[#allocation2] sm:$0xff]  ;;  %v522_v1 = vld [vmem:[#allocation2 + $0x10] sm:$0xff]  ;;  %s495_s20 = smov 1   ;;  %vm55_vm0 = vcmask 1040384  }
  0x14   :  { %112 = vrot.lane.b32.xlu0 %v520_v0, %s495_s20  ;;  %116 = vrot.lane.b32.xlu1 %v522_v1, %s495_s20  ;;  %v526_v2 = vld [vmem:[#allocation2 + $0x8] sm:$0xff]  ;;  %v528_v3 = vld [vmem:[#allocation2 + $0x18] sm:$0xff]  ;;  %v532_v4 = vld [vmem:[#allocation2 + $0x20] sm:$0xff]  ;;  %v56_v16 = vrot.slane %v520_v0, 7  ;;  %v59_v18 = vrot.slane %v522_v1, 7  ;;  %vm208_vm1 = vcmask 1046528  }
  0x15   :  { %v534_v5 = vld [vmem:[#allocation2 + $0x28] sm:$0xff]  ;;  %v538_v6 = vld [vmem:[#allocation2 + $0x30] sm:$0xff]  ;;  %v540_v7 = vld [vmem:[#allocation2 + $0x38] sm:$0xff]  ;;  %v57_v17 = vrot.slane %v526_v2, 7  ;;  %v60_v20 = vrot.slane %v528_v3, 7  ;;  %v62_v28 = vrot.slane %v532_v4, 7 }
  0x16   :  { %v544_v8 = vld [vmem:[#allocation2 + $0x40] sm:$0xff]  ;;  %v546_v9 = vld [vmem:[#allocation2 + $0x48] sm:$0xff]  ;;  %v550_v10 = vld [vmem:[#allocation2 + $0x50] sm:$0xff]  ;;  %v96_v21 = vsub.f32 %v520_v0, %v56_v16  ;;  %v98_v25 = vsub.f32 %v522_v1, %v59_v18  ;;  %v63_v29 = vrot.slane %v534_v5, 7  ;;  %vm249_vm2 = vcmask 130048   ;;  %s496_s0 = smov 127  }
  0x17   :  { %v552_v11 = vld [vmem:[#allocation2 + $0x58] sm:$0xff]  ;;  %v556_v12 = vld [vmem:[#allocation2 + $0x60] sm:$0xff]  ;;  %v558_v13 = vld [vmem:[#allocation2 + $0x68] sm:$0xff]  ;;  %v58_v19 = vsel %vm55_vm0, %v56_v16, %v57_v17  ;;  %v61_v23 = vsel %vm55_vm0, %v59_v18, %v60_v20  ;;  %vm251_vm3 = vcmask 129024   ;;  %v100_v35 = vsub.f32 %v532_v4, %v62_v28  ;;  %s497_s22 = smov [#allocation5]  }
  0x18   :  { %114 = vrot.lane.b32.xlu0 %v526_v2, %s495_s20  ;;  %118 = vrot.lane.b32.xlu1 %v528_v3, %s495_s20  ;;  %v562_v14 = vld [vmem:[#allocation2 + $0x70] sm:$0xff]  ;;  %v564_v15 = vld [vmem:[#allocation2 + $0x78] sm:$0xff]  ;;  %v97_v22 = vsub.f32 %v526_v2, %v58_v19  ;;  %v176_v24 = vmul.f32 %v96_v21, %v96_v21  ;;  %v99_v27 = vsub.f32 %v528_v3, %v61_v23  ;;  %v65_v40 = vrot.slane %v538_v6, 7  ;;  %s425_s23 = sshll.u32 %s497_s22, 4  ;;  %s426_s23 = int_to_ptr.vmem [resolvable:$true] %s425_s23 }
  0x19   :  { %v178_v31 = vmul.f32 %v98_v25, %v98_v25  ;;  %v64_v34 = vsel %vm55_vm0, %v62_v28, %v63_v29  ;;  %v66_v41 = vrot.slane %v540_v7, 7  ;;  %v180_v49 = vmul.f32 %v100_v35, %v100_v35  ;;  %s466_s25 = scalar_lea.vmem %s426_s23, 128  ;;  %p471_p9 = scmp.lt.s32.totalorder %s426_s23, %s426_s23 }
  0x1a   :  { %v177_v26 = vmul.f32 %v97_v22, %v97_v22  ;;  %v209_v30 = vrot.slane %v176_v24, 1  ;;  %v179_v33 = vmul.f32 %v99_v27, %v99_v27  ;;  %v101_v39 = vsub.f32 %v534_v5, %v64_v34  ;;  %p467_p8 = scmp.ne.s32.totalorder %s426_s23, %s466_s25  ;;  %p472_p10 = scmp.lt.s32.totalorder %s466_s25, %s466_s25 }
  0x1b   :  { %v212_v36 = vrot.slane %v178_v31, 1  ;;  %v67_v51 = vsel %vm55_vm0, %v65_v40, %v66_v41  ;;  %v215_v60 = vrot.slane %v180_v49, 1  ;;  %v102_v62 = vsub.f32 %v538_v6, %v65_v40 }
  0x1c   :  { %120 = vrot.lane.b32.xlu0 %v532_v4, %s495_s20  ;;  %122 = vrot.lane.b32.xlu1 %v534_v5, %s495_s20  ;;  %v210_v32 = vrot.slane %v177_v26, 1  ;;  %v213_v38 = vrot.slane %v179_v33, 1  ;;  %v181_v50 = vmul.f32 %v101_v39, %v101_v39  ;;  %v103_v63 = vsub.f32 %v540_v7, %v67_v51  ;;  %p473_p11 = por %p472_p10, %p471_p9 }
  0x1d   :  { %v182_v23 = vmul.f32 %v102_v62, %v102_v62  ;;  %vm371_vm4 = vcmask 121856  }
  0x1e   :  { %v211_v37 = vsel %vm208_vm1, %v209_v30, %v210_v32  ;;  %v252_v45 = vsel %vm251_vm3, %v210_v32, 0.0  ;;  %v214_v48 = vsel %vm208_vm1, %v212_v36, %v213_v38  ;;  %v216_v61 = vrot.slane %v181_v50, 1  ;;  %p474_p12 = pnand %p473_p11, %p467_p8 }
  0x1f   :  { %v250_v44 = vsel %vm249_vm2, %v211_v37, 0.0  ;;  %v254_v56 = vsel %vm249_vm2, %v214_v48, 0.0  ;;  %v183_v24 = vmul.f32 %v103_v63, %v103_v63  ;;  %v71_v36 = vrot.slane %v550_v10, 7 }
  0x20   :  { %124 = vrot.lane.b32.xlu0 %v538_v6, %s495_s20  ;;  %126 = vrot.lane.b32.xlu1 %v540_v7, %s495_s20  ;;  %v253_v53 = vadd.f32 %v252_v45, %v250_v44  ;;  %v217_v22 = vsel %vm208_vm1, %v215_v60, %v216_v61  ;;  %v72_v37 = vrot.slane %v552_v11, 7 }
  0x21   :  { %v258_v30 = vsel %vm249_vm2, %v217_v22, 0.0  ;;  %v219_v33 = vrot.slane %v183_v24, 1 }
  0x22   :  { %v255_v17 = vadd.f32 %v254_v56, %v253_v53  ;;  %v106_v56 = vsub.f32 %v550_v10, %v71_v36 }
  0x24   :  { %128 = vrot.lane.b32.xlu0 %v544_v8, %s495_s20  ;;  %130 = vrot.lane.b32.xlu1 %v546_v9, %s495_s20 }
  0x28   :  { %132 = vrot.lane.b32.xlu0 %v550_v10, %s495_s20  ;;  %134 = vrot.lane.b32.xlu1 %v552_v11, %s495_s20 }
  0x2c   :  { %136 = vrot.lane.b32.xlu0 %v556_v12, %s495_s20  ;;  %138 = vrot.lane.b32.xlu1 %v558_v13, %s495_s20 }
  0x30   :  { %140 = vrot.lane.b32.xlu0 %v562_v14, %s495_s20  ;;  %142 = vrot.lane.b32.xlu1 %v564_v15, %s495_s20 }
  0x86   :  { %v113_v42 = vpop.permute.xlu0 %112  ;;  %v117_v43 = vpop.permute.xlu1 %116 }
  0x87   :  { %v160_v46 = vsub.f32 %v520_v0, %v113_v42  ;;  %v162_v47 = vsub.f32 %v522_v1, %v117_v43  ;;  %v68_v0 = vrot.slane %v544_v8, 7  ;;  %v69_v1 = vrot.slane %v546_v9, 7 }
  0x89   :  { %v291_v52 = vmul.f32 %v160_v46, %v160_v46  ;;  %v293_v57 = vmul.f32 %v162_v47, %v162_v47  ;;  %v70_v25 = vsel %vm55_vm0, %v68_v0, %v69_v1  ;;  %v104_v34 = vsub.f32 %v544_v8, %v68_v0 }
  0x8a   :  { %v115_v54 = vpop.permute.xlu0 %114  ;;  %v119_v55 = vpop.permute.xlu1 %118  ;;  %v105_v35 = vsub.f32 %v546_v9, %v70_v25  ;;  %v73_v47 = vsel %vm55_vm0, %v71_v36, %v72_v37  ;;  %v264_v0 = vsel %vm251_vm3, %v219_v33, 0.0 }
  0x8b   :  { %v161_v58 = vsub.f32 %v526_v2, %v115_v54  ;;  %323 = vrot.lane.b32.xlu0 %v291_v52, %s496_s0  ;;  %v163_v59 = vsub.f32 %v528_v3, %v119_v55  ;;  %v256_v2 = vsel %vm251_vm3, %v213_v38, 0.0  ;;  %v184_v45 = vmul.f32 %v104_v34, %v104_v34 }
  0x8c   :  { %v257_v27 = vadd.f32 %v256_v2, %v255_v17  ;;  %v185_v46 = vmul.f32 %v105_v35, %v105_v35  ;;  %v186_v17 = vmul.f32 %v106_v56, %v106_v56 }
  0x8d   :  { %v292_v16 = vmul.f32 %v161_v58, %v161_v58  ;;  %v294_v20 = vmul.f32 %v163_v59, %v163_v59  ;;  %v221_v54 = vrot.slane %v184_v45, 1  ;;  %v74_v58 = vrot.slane %v556_v12, 7 }
  0x8e   :  { %v121_v18 = vpop.permute.xlu0 %120  ;;  %v123_v19 = vpop.permute.xlu1 %122  ;;  %v259_v39 = vadd.f32 %v258_v30, %v257_v27  ;;  %v222_v55 = vrot.slane %v185_v46, 1  ;;  %v75_v59 = vrot.slane %v558_v13, 7  ;;  %v77_v30 = vrot.slane %v562_v14, 7 }
  0x8f   :  { %327 = vrot.lane.b32.xlu0 %v293_v57, %s496_s0  ;;  %325 = vrot.lane.b32.xlu1 %v292_v16, %s496_s0  ;;  %v164_v3 = vsub.f32 %v532_v4, %v121_v18  ;;  %v165_v21 = vsub.f32 %v534_v5, %v123_v19  ;;  %v218_v5 = vrot.slane %v182_v23, 1  ;;  %v107_v57 = vsub.f32 %v552_v11, %v73_v47 }
  0x90   :  { %v76_v19 = vsel %vm55_vm0, %v74_v58, %v75_v59 }
  0x91   :  { %v295_v26 = vmul.f32 %v164_v3, %v164_v3  ;;  %v296_v31 = vmul.f32 %v165_v21, %v165_v21  ;;  %v220_v44 = vsel %vm208_vm1, %v218_v5, %v219_v33  ;;  %v187_v18 = vmul.f32 %v107_v57, %v107_v57 }
  0x92   :  { %v125_v28 = vpop.permute.xlu0 %124  ;;  %v127_v29 = vpop.permute.xlu1 %126  ;;  %v262_v52 = vsel %vm249_vm2, %v220_v44, 0.0  ;;  %v268_v5 = vsel %vm251_vm3, %v222_v55, 0.0 }
  0x93   :  { %329 = vrot.lane.b32.xlu1 %v294_v20, %s496_s0  ;;  %v166_v32 = vsub.f32 %v538_v6, %v125_v28  ;;  %331 = vrot.lane.b32.xlu0 %v295_v26, %s496_s0  ;;  %v167_v4 = vsub.f32 %v540_v7, %v127_v29  ;;  %v260_v6 = vsel %vm251_vm3, %v216_v61, 0.0  ;;  %v224_v26 = vrot.slane %v186_v17, 1 }
  0x94   :  { %v261_v49 = vadd.f32 %v260_v6, %v259_v39  ;;  %v225_v27 = vrot.slane %v187_v18, 1  ;;  %v108_v28 = vsub.f32 %v556_v12, %v74_v58  ;;  %v109_v29 = vsub.f32 %v558_v13, %v76_v19 }
  0x95   :  { %v297_v38 = vmul.f32 %v166_v32, %v166_v32  ;;  %v298_v42 = vmul.f32 %v167_v4, %v167_v4  ;;  %v110_v39 = vsub.f32 %v562_v14, %v77_v30 }
  0x96   :  { %v129_v40 = vpop.permute.xlu0 %128  ;;  %v131_v41 = vpop.permute.xlu1 %130  ;;  %v263_v61 = vadd.f32 %v262_v52, %v261_v49  ;;  %v226_v34 = vsel %vm208_vm1, %v224_v26, %v225_v27  ;;  %v188_v35 = vmul.f32 %v108_v28, %v108_v28  ;;  %v189_v36 = vmul.f32 %v109_v29, %v109_v29 }
  0x97   :  { %333 = vrot.lane.b32.xlu1 %v296_v31, %s496_s0  ;;  %v168_v7 = vsub.f32 %v544_v8, %v129_v40  ;;  %335 = vrot.lane.b32.xlu0 %v297_v38, %s496_s0  ;;  %v169_v43 = vsub.f32 %v546_v9, %v131_v41  ;;  %v78_v31 = vrot.slane %v564_v15, 7  ;;  %v270_v37 = vsel %vm249_vm2, %v226_v34, 0.0 }
  0x98   :  { %v265_v20 = vadd.f32 %v264_v0, %v263_v61  ;;  %v227_v38 = vrot.slane %v188_v35, 1  ;;  %v228_v41 = vrot.slane %v189_v36, 1 }
  0x99   :  { %v299_v48 = vmul.f32 %v168_v7, %v168_v7  ;;  %v300_v53 = vmul.f32 %v169_v43, %v169_v43  ;;  %v190_v7 = vmul.f32 %v110_v39, %v110_v39 }
  0x9a   :  { %v133_v50 = vpop.permute.xlu0 %132  ;;  %v135_v51 = vpop.permute.xlu1 %134  ;;  %v229_v44 = vsel %vm208_vm1, %v227_v38, %v228_v41 }
  0x9b   :  { %337 = vrot.lane.b32.xlu1 %v298_v42, %s496_s0  ;;  %v170_v8 = vsub.f32 %v550_v10, %v133_v50  ;;  %339 = vrot.lane.b32.xlu0 %v299_v48, %s496_s0  ;;  %v171_v9 = vsub.f32 %v552_v11, %v135_v51  ;;  %v223_v11 = vsel %vm208_vm1, %v221_v54, %v222_v55  ;;  %v272_v42 = vsel %vm251_vm3, %v225_v27, 0.0 }
  0x9c   :  { %v266_v22 = vsel %vm249_vm2, %v223_v11, 0.0  ;;  %v274_v46 = vsel %vm249_vm2, %v229_v44, 0.0  ;;  %v230_v47 = vrot.slane %v190_v7, 1  ;;  %v276_v50 = vsel %vm251_vm3, %v228_v41, 0.0 }
  0x9d   :  { %v301_v60 = vmul.f32 %v170_v8, %v170_v8  ;;  %v302_v1 = vmul.f32 %v171_v9, %v171_v9  ;;  %v267_v4 = vadd.f32 %v266_v22, %v265_v20 }
  0x9e   :  { %v137_v62 = vpop.permute.xlu0 %136  ;;  %v139_v63 = vpop.permute.xlu1 %138 }
  0x9f   :  { %341 = vrot.lane.b32.xlu1 %v300_v53, %s496_s0  ;;  %v172_v16 = vsub.f32 %v556_v12, %v137_v62  ;;  %343 = vrot.lane.b32.xlu0 %v301_v60, %s496_s0  ;;  %v173_v10 = vsub.f32 %v558_v13, %v139_v63  ;;  %v79_v12 = vsel %vm55_vm0, %v77_v30, %v78_v31 }
  0xa0   :  { %v269_v13 = vadd.f32 %v268_v5, %v267_v4  ;;  %v111_v40 = vsub.f32 %v564_v15, %v79_v12 }
  0xa1   :  { %v303_v2 = vmul.f32 %v172_v16, %v172_v16  ;;  %v304_v23 = vmul.f32 %v173_v10, %v173_v10 }
  0xa2   :  { %v141_v3 = vpop.permute.xlu0 %140  ;;  %v143_v21 = vpop.permute.xlu1 %142  ;;  %v271_v6 = vadd.f32 %v270_v37, %v269_v13  ;;  %v191_v43 = vmul.f32 %v111_v40, %v111_v40 }
  0xa3   :  { %345 = vrot.lane.b32.xlu1 %v302_v1, %s496_s0  ;;  %v174_v24 = vsub.f32 %v562_v14, %v141_v3  ;;  %347 = vrot.lane.b32.xlu0 %v303_v2, %s496_s0  ;;  %v175_v25 = vsub.f32 %v564_v15, %v143_v21 }
  0xa4   :  { %v273_v45 = vadd.f32 %v272_v42, %v271_v6  ;;  %v231_v48 = vrot.slane %v191_v43, 1 }
  0xa5   :  { %v305_v32 = vmul.f32 %v174_v24, %v174_v24  ;;  %v306_v33 = vmul.f32 %v175_v25, %v175_v25 }
  0xa6   :  { %v275_v49 = vadd.f32 %v274_v46, %v273_v45  ;;  %v232_v14 = vsel %vm208_vm1, %v230_v47, %v231_v48  ;;  %v280_v53 = vsel %vm251_vm3, %v231_v48, 0.0 }
  0xa7   :  { %349 = vrot.lane.b32.xlu1 %v304_v23, %s496_s0  ;;  %351 = vrot.lane.b32.xlu0 %v305_v32, %s496_s0  ;;  %v278_v15 = vsel %vm249_vm2, %v232_v14, 0.0 }
  0xa8   :  { %v277_v51 = vadd.f32 %v276_v50, %v275_v49 }
  0xaa   :  { %v279_v52 = vadd.f32 %v278_v15, %v277_v51 }
  0xab   :  { %353 = vrot.lane.b32.xlu1 %v306_v33, %s496_s0 }
  0xac   :  { %v281_v8 = vadd.f32 %v280_v53, %v279_v52  ;;  %v412_v52 = vlaneseq }
  0xae   :  { %v413_v53 = vshrl.u32 %v412_v52, 7 }
  0xb0   :  { %vm414_vm5 = vcmp.lt.s32.totalorder %v413_v53, 4 }
  0xc6   :  { %282 = vadd.xlane.f32.xlu0 %v281_v8 }
  0xfd   :  { %v324_v9 = vpop.permute.xlu0 %323 }
  0xfe   :  { %v372_v56 = vsel %vm371_vm4, %v324_v9, 0.0 }
 0x101   :  { %v326_v54 = vpop.permute.xlu1 %325  ;;  %v328_v55 = vpop.permute.xlu0 %327 }
 0x102   :  { %v373_v57 = vsel %vm371_vm4, %v326_v54, 0.0  ;;  %v375_v59 = vsel %vm371_vm4, %v328_v55, 0.0 }
 0x103   :  { %v374_v58 = vadd.f32 %v373_v57, %v372_v56 }
 0x105   :  { %v376_v60 = vadd.f32 %v375_v59, %v374_v58  ;;  %v330_v61 = vpop.permute.xlu1 %329  ;;  %v332_v62 = vpop.permute.xlu0 %331 }
 0x106   :  { %v377_v63 = vsel %vm371_vm4, %v330_v61, 0.0  ;;  %v379_v0 = vsel %vm371_vm4, %v332_v62, 0.0 }
 0x107   :  { %v378_v1 = vadd.f32 %v377_v63, %v376_v60 }
 0x109   :  { %v380_v16 = vadd.f32 %v379_v0, %v378_v1  ;;  %v334_v10 = vpop.permute.xlu1 %333  ;;  %v336_v11 = vpop.permute.xlu0 %335 }
 0x10a   :  { %v381_v17 = vsel %vm371_vm4, %v334_v10, 0.0  ;;  %v383_v18 = vsel %vm371_vm4, %v336_v11, 0.0 }
 0x10b   :  { %v382_v19 = vadd.f32 %v381_v17, %v380_v16 }
 0x10d   :  { %v384_v2 = vadd.f32 %v383_v18, %v382_v19  ;;  %v338_v20 = vpop.permute.xlu1 %337  ;;  %v340_v3 = vpop.permute.xlu0 %339 }
 0x10e   :  { %v385_v21 = vsel %vm371_vm4, %v338_v20, 0.0  ;;  %v387_v22 = vsel %vm371_vm4, %v340_v3, 0.0 }
 0x10f   :  { %v386_v23 = vadd.f32 %v385_v21, %v384_v2 }
 0x111   :  { %v388_v24 = vadd.f32 %v387_v22, %v386_v23  ;;  %v342_v25 = vpop.permute.xlu1 %341  ;;  %v344_v26 = vpop.permute.xlu0 %343 }
 0x112   :  { %v389_v27 = vsel %vm371_vm4, %v342_v25, 0.0  ;;  %v391_v28 = vsel %vm371_vm4, %v344_v26, 0.0 }
 0x113   :  { %v390_v29 = vadd.f32 %v389_v27, %v388_v24 }
 0x115   :  { %v392_v30 = vadd.f32 %v391_v28, %v390_v29  ;;  %v346_v31 = vpop.permute.xlu1 %345  ;;  %v348_v32 = vpop.permute.xlu0 %347 }
 0x116   :  { %v393_v4 = vsel %vm371_vm4, %v346_v31, 0.0  ;;  %v395_v5 = vsel %vm371_vm4, %v348_v32, 0.0 }
 0x117   :  { %v394_v33 = vadd.f32 %v393_v4, %v392_v30 }
 0x119   :  { %v396_v34 = vadd.f32 %v395_v5, %v394_v33  ;;  %v350_v35 = vpop.permute.xlu1 %349  ;;  %v352_v36 = vpop.permute.xlu0 %351 }
 0x11a   :  { %v397_v12 = vsel %vm371_vm4, %v350_v35, 0.0  ;;  %v399_v13 = vsel %vm371_vm4, %v352_v36, 0.0 }
 0x11b   :  { %v398_v37 = vadd.f32 %v397_v12, %v396_v34 }
 0x11d   :  { %v400_v38 = vadd.f32 %v399_v13, %v398_v37  ;;  %v354_v39 = vpop.permute.xlu1 %353 }
 0x11e   :  { %v401_v40 = vsel %vm371_vm4, %v354_v39, 0.0 }
 0x11f   :  { %v402_v41 = vadd.f32 %v401_v40, %v400_v38 }
 0x121   :  { %403 = vadd.xlane.f32.xlu1 %v402_v41 }
 0x153   :  { %v283_v6 = vpop.xlane.xlu0 %282 }
 0x154   :  { %v284_v42 = vrot.slane %v283_v6, 4 }
 0x156   :  { %v285_v7 = vadd.f32 %v284_v42, %v283_v6 }
 0x158   :  { %v286_v43 = vrot.slane %v285_v7, 2 }
 0x15a   :  { %v287_v44 = vadd.f32 %v286_v43, %v285_v7 }
 0x15c   :  { %v288_v45 = vrot.slane %v287_v44, 1 }
 0x15e   :  { %v289_v46 = vadd.f32 %v288_v45, %v287_v44 }
 0x160   :  { %434 = vpush %v289_v46 }
 0x191   :  { %s435_s21 = spop %434 }
 0x192   :  { %v415_v8 = vstv %s435_s21 }
 0x1ae   :  { %v404_v47 = vpop.xlane.xlu1 %403 }
 0x1af   :  { %v405_v48 = vrot.slane %v404_v47, 4 }
 0x1b1   :  { %v406_v49 = vadd.f32 %v405_v48, %v404_v47 }
 0x1b3   :  { %v407_v50 = vrot.slane %v406_v49, 2 }
 0x1b5   :  { %v408_v14 = vadd.f32 %v407_v50, %v406_v49 }
 0x1b7   :  { %v409_v51 = vrot.slane %v408_v14, 1 }
 0x1b9   :  { %v410_v15 = vadd.f32 %v409_v51, %v408_v14 }
 0x1bb   :  { %436 = vpush %v410_v15 }
 0x1ec   :  { %s437_s24 = spop %436 }
 0x1ed   :  { %v416_v9 = vstv %s437_s24 }
 0x1ee   :  { %v417_v54 = vsel %vm414_vm5, %v415_v8, %v416_v9 }
 0x1ef   :  { %418 = vst [vmem:[#allocation5] sm:$0xff] %v417_v54 }
 0x1f0   :  { %477 = shalt.err (!%p474_p12)
}
 0x1f1   :  { %s478_s28 = scalar_lea.hbm %s693_s1, 128 }
 0x1f2   :  { %p479_p13 = scmp.ne.s32.totalorder %s693_s1, %s478_s28  ;;  %p482_p0 = scmp.lt.u32.totalorder %s478_s28, %s693_s1 }
 0x1f4   :  { %p484_p1 = pnand %p482_p0, %p479_p13 }
 0x1f6   :  { %487 = shalt.err (!%p484_p1)
}
 0x1f7   :  { %428 = dma.vmem_to_hbm [thread:$0]  %s426_s23, 128, %s693_s1, [#allocation4]  }
 0x1f8   :  { %490 = dma.done.wait [#allocation4], 128  }
 0x1f9   :  { %491 = vsyncadd [#allocation4], 4294967168 }
 0x1fa   :  { %432 = vsyncpa [#allocation3], 1 }
 0x1fb   :  { %433 = vsyncpa [#allocation4], 1 }

</bundles_post_ra>
